<compile_context>
chip_gen: v5e
topology: v5e:2x2
jax: 0.10.0
libtpu: 0.0.40
codegen_flags: <defaults>
</compile_context>

<pallas_src>
import jax
import jax.numpy as jnp
from jax.experimental import pallas as pl
from jax.experimental.pallas import tpu as pltpu

_LANE = 128
_SUBLANE = 8
_TARGET_BLOCK_BYTES = 8 << 20   # ~8 MiB resident input block keeps DMAs long


def _cdiv(a, b):
    return -(-a // b)


def _round_up(a, b):
    return _cdiv(a, b) * b


def _budgets():
    """(block_budget_bytes, vmem_limit_bytes, multi_core) per TPU generation."""
    try:
        cap = int(pltpu.get_tpu_info().vmem_capacity_bytes)
    except Exception:
        cap = 64 << 20                      # be conservative if query fails
    if cap >= (100 << 20):                  # v5e / v6e: 128 MiB VMEM, 1 TC
        return (80 << 20), (104 << 20), False
    return (24 << 20), (48 << 20), True     # v7x-like: 64 MiB VMEM, 2 TCs


# ---------------------------------------------------------------------------
# Single-pass kernel: each block holds ALL rows of a lane tile.
# ---------------------------------------------------------------------------
def _softmax_single_kernel(x_ref, o_ref):
    x = x_ref[...]
    # max is exact in the input dtype -> avoid one full-block f32 copy.
    x_max = jnp.max(x, axis=0, keepdims=True).astype(jnp.float32)   # (1, T)
    x_exp = jnp.exp(x.astype(jnp.float32) - x_max)                   # (N, T)
    inv = pl.reciprocal(jnp.sum(x_exp, axis=0, keepdims=True), approx=False)
    o_ref[...] = (x_exp * inv).astype(o_ref.dtype)


def _choose_single_pass_tile(n, d, itemsize, block_budget, target_bytes,
                             multi_core):
    """Largest lane tile (multiple of 128) fitting the budget / byte target.
    Returns None when even a 128-lane column slab doesn't fit (-> two-pass)."""
    d_pad = _round_up(d, _LANE)
    # double-buffered in+out blocks + ~3 live f32 temporaries per element
    per_col = n * (2 * 2 * itemsize + 3 * 4)
    max_budget_t = (block_budget // per_col) // _LANE * _LANE
    if max_budget_t < _LANE:
        return None
    max_target_t = max(_LANE,
                       (target_bytes // max(1, n * itemsize)) // _LANE * _LANE)
    tile = min(d_pad, max_budget_t, max_target_t)
    if multi_core:
        # keep >=4 grid steps so each of the 2 TensorCores gets >=2 blocks
        # and can still prefetch/writeback-overlap.
        while tile > _LANE and _cdiv(d, tile) < 4:
            tile -= _LANE
    return tile


def _single_pass_softmax(x, tile_d, vmem_limit):
    n, d = x.shape
    if tile_d >= d:
        tile_d = d                      # full-dim block, no boundary masking
    grid = (_cdiv(d, tile_d),)
    itemsize = x.dtype.itemsize
    cost = pl.CostEstimate(flops=4 * n * d, transcendentals=n * d,
                           bytes_accessed=2 * n * d * itemsize)
    return pl.pallas_call(
        _softmax_single_kernel,
        out_shape=jax.ShapeDtypeStruct((n, d), x.dtype),
        grid_spec=pltpu.PrefetchScalarGridSpec(
            num_scalar_prefetch=0,
            grid=grid,
            in_specs=[pl.BlockSpec((n, tile_d), lambda j: (0, j))],
            out_specs=pl.BlockSpec((n, tile_d), lambda j: (0, j)),
        ),
        compiler_params=pltpu.CompilerParams(
            dimension_semantics=("parallel",),
            vmem_limit_bytes=vmem_limit,
        ),
        cost_estimate=cost,
    )(x)


# ---------------------------------------------------------------------------
# Two-pass (large-N) path: online max/sum over N blocks, then normalize.
# ---------------------------------------------------------------------------
def _make_stats_kernel(n_total, tile_n):
    def kernel(x_ref, m_ref, s_ref):
        k = pl.program_id(1)

        @pl.when(k == 0)
        def _():
            m_ref[...] = jnp.full(m_ref.shape, -jnp.inf, dtype=m_ref.dtype)
            s_ref[...] = jnp.zeros(s_ref.shape, dtype=s_ref.dtype)

        # Mask rows past the end of the array (N boundary block) with -inf so
        # they contribute nothing to the column max / sum.
        rows_valid = jnp.minimum(n_total - k * tile_n, tile_n)
        row_idx = jax.lax.broadcasted_iota(jnp.int32, x_ref.shape, 0)
        x = jnp.where(row_idx < rows_valid,
                      x_ref[...].astype(jnp.float32), -jnp.inf)

        blk_max = jnp.max(x, axis=0, keepdims=True)               # (1, T)
        m_old = m_ref[...]
        m_new = jnp.maximum(m_old, blk_max)
        alpha = jnp.exp(m_old - m_new)                            # 0 at k==0
        s_ref[...] = alpha * s_ref[...] + jnp.sum(jnp.exp(x - m_new),
                                                  axis=0, keepdims=True)
        m_ref[...] = m_new

        @pl.when(k == pl.num_programs(1) - 1)
        def _():
            # store 1/sum so the normalize pass is a pure multiply
            s_ref[...] = pl.reciprocal(s_ref[...], approx=False)

    return kernel


def _normalize_kernel(x_ref, m_ref, inv_ref, o_ref):
    x = x_ref[...].astype(jnp.float32)
    o_ref[...] = (jnp.exp(x - m_ref[...]) * inv_ref[...]).astype(o_ref.dtype)


def _choose_two_pass_tiles(n, d, itemsize, block_budget, target_bytes):
    d_pad = _round_up(d, _LANE)
    tile_d = min(d_pad, 4 * _LANE)
    per_row = tile_d * (2 * 2 * itemsize + 3 * 4)
    tile_n = min(block_budget // per_row,
                 max(1, target_bytes // (tile_d * itemsize)))
    tile_n = max(_SUBLANE, (tile_n // _SUBLANE) * _SUBLANE)
    tile_n = min(tile_n, _round_up(n, _SUBLANE))
    return tile_n, tile_d


def _two_pass_softmax(x, tile_n, tile_d, vmem_limit):
    n, d = x.shape
    if tile_d >= d:
        tile_d = d
    if tile_n >= n:
        tile_n = n
    itemsize = x.dtype.itemsize
    grid = (_cdiv(d, tile_d), _cdiv(n, tile_n))

    stats_cost = pl.CostEstimate(flops=6 * n * d, transcendentals=n * d,
                                 bytes_accessed=n * d * itemsize + 8 * d)
    m, inv = pl.pallas_call(
        _make_stats_kernel(n, tile_n),
        out_shape=(jax.ShapeDtypeStruct((1, d), jnp.float32),
                   jax.ShapeDtypeStruct((1, d), jnp.float32)),
        grid_spec=pltpu.PrefetchScalarGridSpec(
            num_scalar_prefetch=0,
            grid=grid,
            in_specs=[pl.BlockSpec((tile_n, tile_d), lambda j, k: (k, j))],
            out_specs=(pl.BlockSpec((1, tile_d), lambda j, k: (0, j)),
                       pl.BlockSpec((1, tile_d), lambda j, k: (0, j))),
        ),
        compiler_params=pltpu.CompilerParams(
            dimension_semantics=("parallel", "arbitrary"),
            vmem_limit_bytes=vmem_limit,
        ),
        cost_estimate=stats_cost,
    )(x)

    norm_cost = pl.CostEstimate(flops=3 * n * d, transcendentals=n * d,
                                bytes_accessed=2 * n * d * itemsize + 8 * d)
    return pl.pallas_call(
        _normalize_kernel,
        out_shape=jax.ShapeDtypeStruct((n, d), x.dtype),
        grid_spec=pltpu.PrefetchScalarGridSpec(
            num_scalar_prefetch=0,
            grid=grid,
            in_specs=[pl.BlockSpec((tile_n, tile_d), lambda j, k: (k, j)),
                      pl.BlockSpec((1, tile_d), lambda j, k: (0, j)),
                      pl.BlockSpec((1, tile_d), lambda j, k: (0, j))],
            out_specs=pl.BlockSpec((tile_n, tile_d), lambda j, k: (k, j)),
        ),
        compiler_params=pltpu.CompilerParams(
            dimension_semantics=("parallel", "parallel"),
            vmem_limit_bytes=vmem_limit,
        ),
        cost_estimate=norm_cost,
    )(x, m, inv)


# ---------------------------------------------------------------------------
# Public wrapper
# ---------------------------------------------------------------------------
def softmax_stable(x: jax.Array) -> jax.Array:
    """Numerically-stable softmax over axis 0 via Pallas TPU kernels."""
    orig_shape = x.shape
    if x.ndim == 1:
        x2d = x.reshape(x.shape[0], 1)
    elif x.ndim == 2:
        x2d = x
    else:
        # columns are independent -> flatten trailing dims into the lane axis
        x2d = x.reshape(x.shape[0], -1)

    n, d = x2d.shape
    block_budget, vmem_limit, multi_core = _budgets()
    itemsize = x2d.dtype.itemsize

    tile_d = _choose_single_pass_tile(n, d, itemsize, block_budget,
                                      _TARGET_BLOCK_BYTES, multi_core)
    if tile_d is not None:
        out = _single_pass_softmax(x2d, tile_d, vmem_limit)
    else:
        tile_n, td = _choose_two_pass_tiles(n, d, itemsize, block_budget,
                                            _TARGET_BLOCK_BYTES)
        out = _two_pass_softmax(x2d, tile_n, td, vmem_limit)

    return out.reshape(orig_shape)


if __name__ == "__main__":
    def ref_softmax0(x):
        x = x.astype(jnp.float32)
        x_max = jnp.max(x, axis=0, keepdims=True)
        x_exp = jnp.exp(x - x_max)
        return x_exp / jnp.sum(x_exp, axis=0, keepdims=True)

    key = jax.random.PRNGKey(0)
    k1, k2, k3, k4 = jax.random.split(key, 4)

    # 1) lane-aligned shape through the public wrapper (parallel 1-D grid).
    x1 = jax.random.normal(k1, (8, 256), dtype=jnp.float32)
    o1 = jax.block_until_ready(softmax_stable(x1))
    assert o1.shape == x1.shape and o1.dtype == x1.dtype
    assert jnp.allclose(o1, ref_softmax0(x1), atol=1e-6, rtol=1e-6)

    # 2) ragged D through the public wrapper: no pad/slice HBM passes anymore.
    x2 = jax.random.normal(k2, (16, 200), dtype=jnp.float32)
    o2 = jax.block_until_ready(softmax_stable(x2))
    assert o2.shape == x2.shape and o2.dtype == x2.dtype
    assert jnp.allclose(o2, ref_softmax0(x2), atol=1e-6, rtol=1e-6)

    # 3) single-pass with a forced small tile: exercises the cdiv grid and the
    #    masked boundary store on the last lane block.
    o3 = jax.block_until_ready(_single_pass_softmax(x2, 128, 48 << 20))
    assert jnp.allclose(o3, ref_softmax0(x2), atol=1e-6, rtol=1e-6)

    # 4) two-pass (large-N) path with forced small tiles: exercises the online
    #    max/sum accumulation and the masked N / D boundary blocks.
    x4 = jax.random.normal(k3, (40, 200), dtype=jnp.float32)
    o4 = jax.block_until_ready(_two_pass_softmax(x4, 16, 128, 48 << 20))
    assert o4.shape == x4.shape and o4.dtype == x4.dtype
    assert jnp.allclose(o4, ref_softmax0(x4), atol=1e-5, rtol=1e-5)

    # 5) >2-D input: softmax over dim 0, trailing dims flattened to lanes.
    x5 = jax.random.normal(k4, (4, 8, 32), dtype=jnp.float32)
    o5 = jax.block_until_ready(softmax_stable(x5))
    assert o5.shape == x5.shape and o5.dtype == x5.dtype
    assert jnp.allclose(o5, ref_softmax0(x5), atol=1e-6, rtol=1e-6)

    print("KERNEL_OK")
</pallas_src>

<mosaic_0001>
module attributes {stable_mosaic.version = 11 : i64} {
  func.func @_softmax_single_kernel(%arg0: i32, %arg1: memref<8x128xf32, #tpu.memory_space<vmem>>, %arg2: memref<8x128xf32, #tpu.memory_space<vmem>>) attributes {dimension_semantics = [#tpu.dimension_semantics<parallel>], iteration_bounds = array<i64: 2>, scalar_prefetch = 0 : i64, scratch_operands = 0 : i64, tpu.core_type = #tpu.core_type<tc>, window_params = [{transform_indices = @transform_0, window_bounds = array<i64: 8, 128>}, {transform_indices = @transform_1, window_bounds = array<i64: 8, 128>}]} {
    %c0 = arith.constant 0 : index
    %c0_0 = arith.constant 0 : index
    %0 = vector.load %arg1[%c0, %c0_0] : memref<8x128xf32, #tpu.memory_space<vmem>>, vector<8x128xf32>
    %cst = arith.constant dense<0xFF800000> : vector<128xf32>
    %1 = vector.multi_reduction <maximumf>, %0, %cst [0] : vector<8x128xf32> to vector<128xf32>
    %2 = vector.shape_cast %1 : vector<128xf32> to vector<1x128xf32>
    %3 = vector.broadcast %2 : vector<1x128xf32> to vector<8x128xf32>
    %4 = arith.subf %0, %3 : vector<8x128xf32>
    %5 = math.exp %4 : vector<8x128xf32>
    %cst_1 = arith.constant dense<0.000000e+00> : vector<128xf32>
    %6 = vector.multi_reduction <add>, %5, %cst_1 [0] : vector<8x128xf32> to vector<128xf32>
    %7 = vector.shape_cast %6 : vector<128xf32> to vector<1x128xf32>
    %8 = tpu.reciprocal %7 : vector<1x128xf32> -> vector<1x128xf32>
    %9 = vector.broadcast %8 : vector<1x128xf32> to vector<8x128xf32>
    %10 = arith.mulf %5, %9 : vector<8x128xf32>
    %c0_2 = arith.constant 0 : index
    %c0_3 = arith.constant 0 : index
    %11 = vector.load %arg2[%c0_2, %c0_3] : memref<8x128xf32, #tpu.memory_space<vmem>>, vector<8x128xf32>
    tpu.vector_store %arg2[%c0_2, %c0_3], %10 {strides = array<i32>} : memref<8x128xf32, #tpu.memory_space<vmem>>, vector<8x128xf32>,
    return
  }
  func.func @transform_0(%arg0: i32) -> (i32, i32) {
    %c0_i32 = arith.constant 0 : i32
    %c0_i32_0 = arith.constant 0 : i32
    return %c0_i32, %arg0 : i32, i32
  }
  func.func @transform_1(%arg0: i32) -> (i32, i32) {
    %c0_i32 = arith.constant 0 : i32
    %c0_i32_0 = arith.constant 0 : i32
    return %c0_i32, %arg0 : i32, i32
  }
}

</mosaic_0001>

<bundles_post_ra>
// kernel: tpu_custom_call.1
= control target key start
LH: loop header
LB: loop body
LE: loop exit
PB: predicated region body
PF: predicated region fallthrough
CT: control target
= control target key end

     0   :  { %6 = vsyncpa [#allocation3], 0  ;;  %s553_s0 = inlined_call_operand.hbm [shape: f32[8,256], index: 0, kind: input, shape index: {}]   ;;  %s554_s1 = inlined_call_operand.hbm [shape: f32[8,256], index: 1, kind: output, shape index: {}]  }
   0x1   :  { %8 = vsyncpa [#allocation3 + $0x1], 0 }
   0x2   :  { %9 = vsyncpa [#allocation4], 0 }
   0x3   :  { %11 = vsyncpa [#allocation4 + $0x1], 0  ;;  %s422_s6 = smov 0   ;;  %s424_s7 = smov 0  }
   0x4   :  { %s426_s8 = smov 0   ;;  %s428_s9 = smov 0  }
   0x5 LB: > { %s443_s10 = sadd.s32 4294967295, %s410_s9   ;;  %s252_s11 = sadd.s32 4294967294, %s410_s9   ;;  %s410_s9 = sphi %s428_s9, %s564_s9   ;;  %s406_s8 = sphi %s426_s8, %s563_s8   ;;  %s402_s7 = sphi %s424_s7, %s562_s7   ;;  %s398_s6 = sphi %s422_s6, %s561_s6  }
   0x6   : > { %s447_s12 = sadd.s32 1, %s410_s9   ;;  %s24_s13 = sadd.s32 1, %s406_s8 }
   0x7   : > { %s21_s14 = ssub.s32 %s410_s9, %s447_s12  ;;  %p31_p0 = scmp.ne.s32.totalorder %s406_s8, %s402_s7 }
   0x8   : > { %p22_p1 = scmp.eq.s32.totalorder %s21_s14, 0  ;;  %p32_p2 = scmp.eq.s32.totalorder %s410_s9, 0 }
   0x9   : > { %p37_p3 = scmp.ne.s32.totalorder %s402_s7, %s398_s6  ;;  %p38_p4 = scmp.eq.s32.totalorder %s443_s10, 0 }
   0xa   : > { %s459_s15 = scalar_select %p22_p1, %s406_s8, %s24_s13  }
   0xb   : > { %p461_p5 = por %p32_p2, %p31_p0  ;;  %p465_p6 = por %p38_p4, %p37_p3 }
   0xc   : > { %p61_p7 = scmp.eq.s32.totalorder %s443_s10, 1  ;;  %p67_p8 = scmp.eq.s32.totalorder %s252_s11, 1 }
   0xd   : > { %p276_p10 = scmp.lt.s32.totalorder %s410_s9, 2  ;;  %s87_s20 = sand.u32 1, %s406_s8  }
   0xe   : > { %p472_p11 = por %p61_p7, %p31_p0  ;;  %p476_p12 = por %p67_p8, %p37_p3 }
   0xf   : > { %s256_s21 = sshll.u32 %s410_s9, 3  ;;  %s255_s22 = sshll.u32 %s87_s20, 3 }
  0x10   : > { %s95_s25 = scalar_lea.hbm %s553_s0, %s256_s21  ;;  %s91_s27 = scalar_lea.vmem [#allocation2], %s255_s22 }
  0x11   : > { %s97_s26 = sshll.u32 %s95_s25, 4  ;;  %s99_s28 = sshll.u32 %s91_s27, 4  ;;  %s98_s26 = int_to_ptr.hbm [resolvable:$true] %s97_s26  ;;  %s100_s28 = int_to_ptr.vmem [resolvable:$true] %s99_s28 }
  0x12   : > { %p487_p13 = pnand %p276_p10, %p461_p5  ;;  %p257_p0 = scmp.ge.s32.totalorder %s410_s9, 1 }
  0x13   : > { %p104_p1 = scmp.lt.s32.totalorder %s410_s9, 3  ;;  %s88_s30 = scalar_lea.sflag [#allocation3], %s87_s20 }
  0x14   : > { %s314_s2 = sshra.s32 %s98_s26, 4  ;;  %p318_p3 = pneg %p487_p13  ;;  %s315_s2 = int_to_ptr.hbm [resolvable:$true] %s314_s2 }
  0x15   : > { %s316_s3 = scalar_lea.hbm %s315_s2, 8  ;;  %s321_s11 = scalar_lea.hbm %s553_s0, 16 }
  0x16   : > { %p317_p2 = scmp.ne.s32.totalorder %s315_s2, %s316_s3  ;;  %p322_p5 = scmp.lt.s32.totalorder %s315_s2, %s553_s0 }
  0x17   : > { %p323_p8 = scmp.lt.s32.totalorder %s321_s11, %s316_s3 }
  0x18   : > { %p319_p4 = pnand %p318_p3, %p317_p2 }
  0x19   : > { %p324_p10 = por %p323_p8, %p322_p5 }
  0x1a   : > { %p320_p7 = pneg %p319_p4 }
  0x1c   : > { %p325_p9 = pnand %p324_p10, %p320_p7 }
  0x1e   : > { %328 = shalt.err (!%p325_p9)
}
  0x1f   : > { %271 = dma.hbm_to_vmem [thread:$0]  (!%p487_p13), %s98_s26, 128, %s100_s28, %s88_s30  }
  0x20   : > { %p105_p2 = pnand %p257_p0, %p104_p1 }
  0x21   : > { %s508_s16 = sand.u32 (!%p105_p2), 1, %s402_s7  }
  0x22   : > { %108 = sbr.rel (%p105_p2) target bundleno = 98 (0x62), region = 24  ;;  %s258_s20 = sshll.u32 (!%p105_p2), %s508_s16, 3 }
  0x23   : > { %s111_s21 = scalar_lea.sflag (!%p105_p2), [#allocation3], %s508_s16  ;;  %s114_s22 = scalar_lea.vmem (!%p105_p2), [#allocation2], %s258_s20 }
  0x27   : > { %389 = dma.done.wait (%p465_p6), %s111_s21, 128  }
  0x28   : > { %391 = vsyncadd (%p465_p6), %s111_s21, 4294967168  ;;  %v134_v0 = vld [vmem:[%s114_s22] sm:$0xff]  ;;  %s261_s17 = sshll.u32 %s443_s10, 3  ;;  %s133_s26 = scalar_lea.vmem [#allocation5], %s258_s20 }
  0x29   : > { %v135_v1 = vrot.slane %v134_v0, 4  ;;  %s177_s25 = scalar_lea.hbm %s554_s1, %s261_s17  ;;  %s179_s27 = sshll.u32 %s133_s26, 4  ;;  %s180_s27 = int_to_ptr.vmem [resolvable:$true] %s179_s27 }
  0x2a   : > { %s181_s28 = sshll.u32 %s177_s25, 4  ;;  %s167_s10 = scalar_lea.sflag [#allocation4], %s508_s16  ;;  %s182_s28 = int_to_ptr.hbm [resolvable:$true] %s181_s28 }
  0x2b   : > { %v136_v2 = vmax.f32 %v134_v0, %v135_v1  ;;  %s358_s29 = sshra.s32 %s182_s28, 4  ;;  %s364_s4 = scalar_lea.hbm %s554_s1, 16  ;;  %s359_s29 = int_to_ptr.hbm [resolvable:$true] %s358_s29 }
  0x2c   : > { %s360_s30 = scalar_lea.hbm %s359_s29, 8  ;;  %p365_p0 = scmp.lt.s32.totalorder %s359_s29, %s554_s1 }
  0x2d   : > { %v137_v3 = vrot.slane %v136_v2, 2  ;;  %p361_p6 = scmp.ne.s32.totalorder %s359_s29, %s360_s30  ;;  %p366_p1 = scmp.lt.s32.totalorder %s364_s4, %s360_s30 }
  0x2f   : > { %v138_v4 = vmax.f32 %v136_v2, %v137_v3  ;;  %p362_p9 = pnand %p361_p6, %p472_p11  ;;  %p367_p3 = por %p366_p1, %p365_p0 }
  0x31   : > { %v139_v5 = vrot.slane %v138_v4, 1  ;;  %p363_p13 = pneg %p362_p9 }
  0x33   : > { %v140_v6 = vmax.f32 %v138_v4, %v139_v5  ;;  %p368_p4 = pnand %p367_p3, %p363_p13 }
  0x35   : > { %v141_v7 = vsub.f32 %v134_v0, %v140_v6 }
  0x37   : > { %v142_v8 = vmul.f32 1.442695, %v141_v7 }
  0x39   : > { %310 = vpow2.f32 %v142_v8 }
  0x3f   : > { %v311_v9 = vpop.eup %310 }
  0x40   : > { %v144_v10 = vrot.slane %v311_v9, 4 }
  0x42   : > { %v145_v11 = vadd.f32 %v311_v9, %v144_v10 }
  0x44   : > { %v146_v12 = vrot.slane %v145_v11, 2 }
  0x46   : > { %v147_v13 = vadd.f32 %v146_v12, %v145_v11 }
  0x48   : > { %v148_v14 = vrot.slane %v147_v13, 1 }
  0x4a   : > { %v149_v15 = vadd.f32 %v148_v14, %v147_v13 }
  0x4c   : > { %312 = vrcp.f32 %v149_v15  ;;  %v161_v18 = vand.u32 2147483648, %v149_v15  ;;  %vm155_vm0 = vweird.f32 %v149_v15  ;;  %v159_v20 = vand.u32 2147483647, %v149_v15 }
  0x4e   : > { %v162_v22 = vor.u32 1.1754944e-38, %v161_v18  ;;  %vm160_vm3 = vcmp.eq.f32.partialorder %v159_v20, 8.507059e+37 }
  0x52   : > { %v313_v16 = vpop.eup %312 }
  0x53   : > { %v151_v17 = vmul.f32 %v313_v16, %v149_v15  ;;  %vm156_vm1 = vweird.f32 %v313_v16 }
  0x54   : > { %vm157_vm2 = vmor %vm155_vm0, %vm156_vm1 }
  0x55   : > { %v152_v19 = vsub.f32 1.0, %v151_v17 }
  0x57   : > { %v153_v21 = vmul.f32 %v313_v16, %v152_v19 }
  0x59   : > { %v154_v23 = vadd.f32 %v313_v16, %v153_v21 }
  0x5b   : > { %v158_v24 = vsel %vm157_vm2, %v313_v16, %v154_v23 }
  0x5c   : > { %v163_v25 = vsel %vm160_vm3, %v162_v22, %v158_v24 }
  0x5d   : > { %v164_v26 = vmul.f32 %v311_v9, %v163_v25 }
  0x5f   : > { %165 = vst [vmem:[%s133_s26] sm:$0xff] %v164_v26 }
  0x60   : > { %371 = shalt.err (!%p368_p4)
}
  0x61   : > { %266 = dma.vmem_to_hbm [thread:$0]  (%p472_p11), %s180_s27, 128, %s182_s28, %s167_s10  }
  0x62 PF: > { %s193_s13 = sand.u32 1, %s398_s6   ;;  %p560_p7 = scmp.ge.s32.totalorder %s410_s9, 2 }
  0x63   : > { %s194_s14 = scalar_lea.sflag [#allocation4], %s193_s13 }
  0x64   : > { %p273_p5 = pnand %p560_p7, %p476_p12 }
  0x66   : > { %p274_p8 = pneg %p273_p5 }
  0x68   : > { %393 = dma.done.wait (%p274_p8), %s194_s14, 128  }
  0x69   : > { %395 = vsyncadd (%p274_p8), %s194_s14, 4294967168  ;;  %p14_p10 = scmp.ge.s32.totalorder %s447_s12, 4   ;;  %s561_s6 = smov %s402_s7 }
  0x6a   : > { %s562_s7 = smov %s406_s8  ;;  %s563_s8 = smov %s459_s15 }
  0x6b   : > { %s564_s9 = smov %s447_s12  ;;  %16 = sbr.rel (!%p14_p10) target bundleno = 5 (0x5), region = 69 }
  0x70   :  { %200 = vsyncpa [#allocation3], 1 }
  0x71   :  { %202 = vsyncpa [#allocation3 + $0x1], 1 }
  0x72   :  { %203 = vsyncpa [#allocation4], 1 }
  0x73   :  { %205 = vsyncpa [#allocation4 + $0x1], 1 }

</bundles_post_ra>
